<compile_context>
chip_gen: v7x
topology: tpu7x:2x2x1
jax: 0.10.0
libtpu: 0.0.40
codegen_flags: <defaults>
</compile_context>

<pallas_src>
import jax
import jax.numpy as jnp
import numpy as np
from jax.experimental import pallas as pl
from jax.experimental.pallas import tpu as pltpu


# ---------------------------------------------------------------------------
# Primary path: zero-copy aliased pass-through.
# ---------------------------------------------------------------------------
def _alias_passthrough_kernel(x_hbm_ref, o_hbm_ref):
    # forward(x) returns x and the output buffer aliases the input buffer:
    # there is nothing to compute and nothing to move.
    del x_hbm_ref, o_hbm_ref


def _passthrough_impl(x: jax.Array) -> jax.Array:
    return pl.pallas_call(
        _alias_passthrough_kernel,
        out_shape=jax.ShapeDtypeStruct(x.shape, x.dtype),
        in_specs=[pl.BlockSpec(memory_space=pl.ANY)],   # raw HBM ref, no DMA
        out_specs=pl.BlockSpec(memory_space=pl.ANY),    # raw HBM ref, no DMA
        input_output_aliases={0: 0},                    # output IS the input
    )(x)


# Donation makes the aliasing real: without it XLA inserts a defensive
# full-array copy in front of the in-place custom call.
_passthrough = jax.jit(_passthrough_impl, donate_argnums=(0,))


# ---------------------------------------------------------------------------
# Fallback path: tiled VMEM copy (only if the no-op form fails to lower).
# ---------------------------------------------------------------------------
def _copy_kernel(x_ref, o_ref):
    o_ref[...] = x_ref[...]


_TARGET_TILE_BYTES = 4 * 1024 * 1024   # fits v7x (64 MiB VMEM) double-buffered


def _tiled_copy_impl(x: jax.Array) -> jax.Array:
    orig_shape = x.shape
    # Collapse ONLY leading dims (always layout-free); keep the original last
    # dim on the lane axis so no physical relayout is introduced.
    if x.ndim == 0:
        x2 = x.reshape(1, 1)
    elif x.ndim == 1:
        x2 = x.reshape(1, orig_shape[0])
    else:
        rows = 1
        for d in orig_shape[:-1]:
            rows *= d
        x2 = x.reshape(rows, orig_shape[-1])
    r, c = x2.shape
    itemsize = jnp.dtype(x.dtype).itemsize

    # ~4 MiB row-tiles, rounded to a sublane multiple of 8 (block second-to-
    # last dim must be a multiple of 8 or the full extent).
    tile_r = max(8, (_TARGET_TILE_BYTES // max(1, c * itemsize)) // 8 * 8)
    tile_r = min(tile_r, r)
    if r >= 16:
        # Guarantee >=2 grid steps so "parallel" can shard across both v7x TCs.
        tile_r = min(tile_r, max(8, ((r + 15) // 16) * 8))

    c_padded = ((c + 127) // 128) * 128
    tile_bytes = tile_r * c_padded * itemsize
    # 2 specs x 2 pipeline buffers + slack; never a flat 64 MiB request.
    vmem_limit = int(max(4 * tile_bytes + (2 << 20), 16 << 20))

    out2d = pl.pallas_call(
        _copy_kernel,
        out_shape=jax.ShapeDtypeStruct((r, c), x.dtype),
        grid_spec=pltpu.PrefetchScalarGridSpec(
            num_scalar_prefetch=0,
            grid=(pl.cdiv(r, tile_r),),
            in_specs=[pl.BlockSpec((tile_r, c), lambda i: (i, 0))],
            out_specs=pl.BlockSpec((tile_r, c), lambda i: (i, 0)),
        ),
        compiler_params=pltpu.CompilerParams(
            dimension_semantics=("parallel",),
            vmem_limit_bytes=vmem_limit,
        ),
        input_output_aliases={0: 0},
    )(x2)
    return out2d.reshape(orig_shape)


_tiled_copy = jax.jit(_tiled_copy_impl, donate_argnums=(0,))


# ---------------------------------------------------------------------------
# Public forward: LSTM.forward(x) == x.
# ---------------------------------------------------------------------------
_use_fallback = False


def lstm_forward(x: jax.Array) -> jax.Array:
    """Identity forward of LSTM.forward(x), routed through Pallas."""
    global _use_fallback
    if x.size == 0:
        return x
    if not _use_fallback:
        try:
            return _passthrough(x)
        except Exception:
            # Zero-copy form could not be lowered on this backend; use the
            # tiled-copy kernel from now on.
            _use_fallback = True
    return _tiled_copy(x)


# TODO(synk): LSTM_RESHAPE (x.view(-1, x.shape[2], x.shape[1])) is registered
# inside self.lstm but never invoked by LSTM.forward, so it is intentionally
# not part of the kernel.


if __name__ == "__main__":
    key = jax.random.PRNGKey(0)
    k1, k2 = jax.random.split(key)

    # LSTM-style input: (batch=2, channels=4, seq=16).
    x = jax.random.normal(k1, (2, 4, 16), dtype=jnp.float32)
    x_host = np.asarray(x)              # inputs are donated; keep host copies
    y = jax.block_until_ready(lstm_forward(x))
    assert y.shape == x_host.shape, (y.shape, x_host.shape)
    assert y.dtype == x_host.dtype, (y.dtype, x_host.dtype)
    assert np.array_equal(np.asarray(y), x_host), "identity forward mismatch"

    # Awkward, non-aligned shape (exercises the general-shape handling).
    x2 = jax.random.normal(k2, (3, 5, 17), dtype=jnp.float32)
    x2_host = np.asarray(x2)
    y2 = jax.block_until_ready(lstm_forward(x2))
    assert y2.shape == x2_host.shape, (y2.shape, x2_host.shape)
    assert np.array_equal(np.asarray(y2), x2_host), "identity mismatch (ragged)"

    print("KERNEL_OK")
</pallas_src>

<mosaic_0001>
module attributes {stable_mosaic.version = 11 : i64} {
  func.func @_alias_passthrough_kernel(%arg0: memref<2x4x16xf32, #tpu.memory_space<any>>, %arg1: memref<2x4x16xf32, #tpu.memory_space<any>>) attributes {dimension_semantics = [], scalar_prefetch = 0 : i64, scratch_operands = 0 : i64, tpu.core_type = #tpu.core_type<tc>} {
    return
  }
}

module attributes {stable_mosaic.version = 11 : i64} {
  func.func @_copy_kernel(%arg0: i32, %arg1: memref<8x16xf32, #tpu.memory_space<vmem>>, %arg2: memref<8x16xf32, #tpu.memory_space<vmem>>) attributes {dimension_semantics = [#tpu.dimension_semantics<parallel>], iteration_bounds = array<i64: 1>, scalar_prefetch = 0 : i64, scratch_operands = 0 : i64, tpu.core_type = #tpu.core_type<tc>, window_params = [{transform_indices = @transform_0, window_bounds = array<i64: 8, 16>}, {transform_indices = @transform_1, window_bounds = array<i64: 8, 16>}]} {
    %c0 = arith.constant 0 : index
    %c0_0 = arith.constant 0 : index
    %0 = vector.load %arg1[%c0, %c0_0] : memref<8x16xf32, #tpu.memory_space<vmem>>, vector<8x16xf32>
    %c0_1 = arith.constant 0 : index
    %c0_2 = arith.constant 0 : index
    %1 = vector.load %arg2[%c0_1, %c0_2] : memref<8x16xf32, #tpu.memory_space<vmem>>, vector<8x16xf32>
    tpu.vector_store %arg2[%c0_1, %c0_2], %0 {strides = array<i32>} : memref<8x16xf32, #tpu.memory_space<vmem>>, vector<8x16xf32>,
    return
  }
  func.func @transform_0(%arg0: i32) -> (i32, i32) {
    %c0_i32 = arith.constant 0 : i32
    %c0_i32_0 = arith.constant 0 : i32
    return %arg0, %c0_i32 : i32, i32
  }
  func.func @transform_1(%arg0: i32) -> (i32, i32) {
    %c0_i32 = arith.constant 0 : i32
    %c0_i32_0 = arith.constant 0 : i32
    return %arg0, %c0_i32 : i32, i32
  }
}

</mosaic_0001>

<bundles_post_ra>
// kernel: _passthrough_impl.1
= control target key start
LH: loop header
LB: loop body
LE: loop exit
PB: predicated region body
PF: predicated region fallthrough
CT: control target
= control target key end

     0   :  { %s16_s0 = inlined_call_operand.hbm [shape: f32[2,4,16], index: 0, kind: input, shape index: {}, may-alias: {0,1}]   ;;  %s17_s1 = inlined_call_operand.hbm [shape: f32[2,4,16], index: 1, kind: output, shape index: {}, may-alias: {0,1}]  }

// kernel: _tiled_copy_impl.1
= control target key start
LH: loop header
LB: loop body
LE: loop exit
PB: predicated region body
PF: predicated region fallthrough
CT: control target
= control target key end

     0   :  { %6 = vsyncpa [#allocation3], 0  ;;  %s125_s0 = inlined_call_operand.hbm [shape: f32[8,16], index: 0, kind: input, shape index: {}, may-alias: {0,1}]   ;;  %s126_s1 = inlined_call_operand.hbm [shape: f32[8,16], index: 1, kind: output, shape index: {}, may-alias: {0,1}]  }
   0x1   :  { %7 = vsyncpa [#allocation4], 0  ;;  %s89_s6 = smov [#allocation2]   ;;  %s41_s10 = scalar_lea.hbm %s125_s0, 128 }
   0x2   :  { %s14_s7 = sshll.u32 %s89_s6, 4  ;;  %p42_p0 = scmp.ne.s32.totalorder %s125_s0, %s41_s10  ;;  %s15_s7 = int_to_ptr.vmem [resolvable:$true] %s14_s7 }
   0x3   :  { %p45_p1 = scmp.lt.u32.totalorder %s41_s10, %s125_s0 }
   0x5   :  { %p47_p2 = pnand %p45_p1, %p42_p0 }
   0x7   :  { %50 = shalt.err (!%p47_p2)
}
   0x8   :  { %s51_s15 = scalar_lea.vmem %s15_s7, 128  ;;  %p56_p4 = scmp.lt.s32.totalorder %s15_s7, %s15_s7 }
   0x9   :  { %p52_p3 = scmp.ne.s32.totalorder %s15_s7, %s51_s15  ;;  %p57_p5 = scmp.lt.s32.totalorder %s51_s15, %s51_s15 }
   0xb   :  { %p58_p6 = por %p57_p5, %p56_p4 }
   0xd   :  { %p59_p7 = pnand %p58_p6, %p52_p3 }
   0xf   :  { %62 = shalt.err (!%p59_p7)
}
  0x10   :  { %17 = dma.hbm_to_vmem [thread:$0]  %s125_s0, 128, %s15_s7, [#allocation3]  }
  0x11   :  { %85 = dma.done.wait [#allocation3], 128  }
  0x12   :  { %86 = vsyncadd [#allocation3], 4294967168  ;;  %s90_s18 = smov [#allocation5]   ;;  %vm22_vm0 = vcmask 130048   ;;  %v21_v0 = vld [vmem:[#allocation2] sm:$0xff] }
  0x13   :  { %s30_s19 = sshll.u32 %s90_s18, 4  ;;  %23 = vst.msk [vmem:[#allocation5] sm:$0xff] %vm22_vm0, %v21_v0  ;;  %s31_s19 = int_to_ptr.vmem [resolvable:$true] %s30_s19 }
  0x14   :  { %s63_s20 = scalar_lea.vmem %s31_s19, 128  ;;  %p68_p9 = scmp.lt.s32.totalorder %s31_s19, %s31_s19 }
  0x15   :  { %p64_p8 = scmp.ne.s32.totalorder %s31_s19, %s63_s20  ;;  %p69_p10 = scmp.lt.s32.totalorder %s63_s20, %s63_s20 }
  0x17   :  { %p70_p11 = por %p69_p10, %p68_p9 }
  0x19   :  { %p71_p12 = pnand %p70_p11, %p64_p8 }
  0x1b   :  { %74 = shalt.err (!%p71_p12)
}
  0x1c   :  { %s75_s23 = scalar_lea.hbm %s126_s1, 128 }
  0x1d   :  { %p76_p13 = scmp.ne.s32.totalorder %s126_s1, %s75_s23  ;;  %p79_p0 = scmp.lt.u32.totalorder %s75_s23, %s126_s1 }
  0x1f   :  { %p81_p1 = pnand %p79_p0, %p76_p13 }
  0x21   :  { %84 = shalt.err (!%p81_p1)
}
  0x22   :  { %33 = dma.vmem_to_hbm [thread:$0]  %s31_s19, 128, %s126_s1, [#allocation4]  }
  0x23   :  { %87 = dma.done.wait [#allocation4], 128  }
  0x24   :  { %88 = vsyncadd [#allocation4], 4294967168 }
  0x25   :  { %37 = vsyncpa [#allocation3], 1 }
  0x26   :  { %38 = vsyncpa [#allocation4], 1 }

</bundles_post_ra>
